<compile_context>
chip_gen: v7x
topology: tpu7x:2x2x1
jax: 0.10.0
libtpu: 0.0.40
codegen_flags: <defaults>
</compile_context>

<pallas_src>
import functools

import jax
import jax.numpy as jnp
import numpy as np
from jax import lax
from jax.experimental import pallas as pl
from jax.experimental.pallas import tpu as pltpu

LANE = 128      # lane width (last-dim alignment for f32)
SUBLANE = 8     # sublane count (second-minor alignment for f32)


def _round_up(n, m):
    return ((n + m - 1) // m) * m


def _pad_dim(x, axis, mult):
    """Zero-pad `x` along `axis` up to the next multiple of `mult`."""
    pad = _round_up(x.shape[axis], mult) - x.shape[axis]
    if pad == 0:
        return x
    widths = [(0, 0)] * x.ndim
    widths[axis] = (0, pad)
    return jnp.pad(x, widths)


# ----------------------------------------------------------------------------
# Kernel bodies
# ----------------------------------------------------------------------------
def _encode_tile(emb, mask3, w, b, do_normalize):
    """emb:[TB,S,E]  mask3:[TB,1,S]  w:[E,H]  b:[1,H]  ->  rep:[TB,H].

    E and H are lane-padded (multiples of 128); padded columns are zero and
    stay zero through the whole pipeline.
    """
    # Masked-sum pooling as a batched MXU contraction (the mask row acts as a
    # [1,S] matrix).  Avoids the mask lane->sublane broadcast relayout and the
    # XLU sublane reduction of the naive (emb * mask[:, :, None]).sum(1).
    pooled3 = jnp.einsum("bqs,bse->bqe", mask3, emb,
                         preferred_element_type=jnp.float32)       # [TB,1,E]
    denom = jnp.maximum(jnp.sum(mask3, axis=-1), 1.0)              # [TB,1]
    pooled = pooled3[:, 0, :] / denom                              # [TB,E]
    y = jnp.dot(pooled, w, preferred_element_type=jnp.float32) + b
    rep = jnp.tanh(y)                                              # [TB,H]
    if do_normalize:
        # eps-guarded L2 normalize (rsqrt -> EUP slot; guard avoids NaN for an
        # exactly-zero representation, e.g. fully-masked row with zero bias).
        ss = jnp.sum(rep * rep, axis=-1, keepdims=True)
        rep = rep * lax.rsqrt(jnp.maximum(ss, 1e-18))
    return rep


def _encode_kernel(emb_ref, mask_ref, w_ref, b_ref, rep_ref, *, do_normalize):
    rep_ref[...] = _encode_tile(emb_ref[...], mask_ref[...], w_ref[...],
                                b_ref[...], do_normalize)


def _encode_score_kernel(emb_ref, mask_ref, w_ref, b_ref, drep_ref,
                         rep_ref, score_ref, *, do_normalize):
    rep = _encode_tile(emb_ref[...], mask_ref[...], w_ref[...], b_ref[...],
                       do_normalize)
    rep_ref[...] = rep
    # q @ d.T with the contraction on the LAST dim of both operands: feeds the
    # MXU directly, no in-kernel transpose of d_rep.  Output is lane-dense
    # because d_rep rows were padded to a multiple of 128 in the wrapper.
    score_ref[...] = lax.dot_general(
        rep, drep_ref[...],
        dimension_numbers=(((1,), (1,)), ((), ())),
        preferred_element_type=jnp.float32)


# ----------------------------------------------------------------------------
# pallas_call wrappers
# ----------------------------------------------------------------------------
def _prep_tokens(params, input_ids, attention_mask, tb):
    ids = _pad_dim(jnp.asarray(input_ids, jnp.int32), 0, tb)
    mask = _pad_dim(jnp.asarray(attention_mask, jnp.float32), 0, tb)
    # TODO(synk): replace this HBM-materialized gather with an in-kernel
    # scalar-prefetch + DMA row gather for large vocabularies.
    emb = params["emb"][ids]                       # [Bp, S, Ep]
    mask3 = mask[:, None, :]                       # [Bp, 1, S] (wrapper-side reshape)
    return emb, mask3


def encode_pallas(params, input_ids, attention_mask, *, do_normalize,
                  tb=SUBLANE):
    """Fused encode (+ optional L2 normalize).  Returns padded rep [Bp, Hp]."""
    emb, mask3 = _prep_tokens(params, input_ids, attention_mask, tb)
    Bp, S, Ep = emb.shape
    Hp = params["w"].shape[1]
    return pl.pallas_call(
        functools.partial(_encode_kernel, do_normalize=do_normalize),
        out_shape=jax.ShapeDtypeStruct((Bp, Hp), jnp.float32),
        grid=(Bp // tb,),
        in_specs=[
            pl.BlockSpec((tb, S, Ep), lambda i: (i, 0, 0)),
            pl.BlockSpec((tb, 1, S), lambda i: (i, 0, 0)),
            pl.BlockSpec((Ep, Hp), lambda i: (0, 0)),
            pl.BlockSpec((1, Hp), lambda i: (0, 0)),
        ],
        out_specs=pl.BlockSpec((tb, Hp), lambda i: (i, 0)),
        compiler_params=pltpu.CompilerParams(
            dimension_semantics=("parallel",)),
    )(emb, mask3, params["w"], params["b"])


def encode_and_score_pallas(params, input_ids, attention_mask, d_rep_pad, *,
                            do_normalize, tb=SUBLANE):
    """Fused query encode (+ normalize) + scoring against resident d_rep.

    Returns (q_rep [Bp, Hp], score [Bp, Bd_pad]) — both padded.
    """
    emb, mask3 = _prep_tokens(params, input_ids, attention_mask, tb)
    Bp, S, Ep = emb.shape
    Hp = params["w"].shape[1]
    Bdp, Hd = d_rep_pad.shape           # Bdp is a multiple of 128 -> dense stores
    rep, score = pl.pallas_call(
        functools.partial(_encode_score_kernel, do_normalize=do_normalize),
        out_shape=(jax.ShapeDtypeStruct((Bp, Hp), jnp.float32),
                   jax.ShapeDtypeStruct((Bp, Bdp), jnp.float32)),
        grid=(Bp // tb,),
        in_specs=[
            pl.BlockSpec((tb, S, Ep), lambda i: (i, 0, 0)),
            pl.BlockSpec((tb, 1, S), lambda i: (i, 0, 0)),
            pl.BlockSpec((Ep, Hp), lambda i: (0, 0)),
            pl.BlockSpec((1, Hp), lambda i: (0, 0)),
            pl.BlockSpec((Bdp, Hd), lambda i: (0, 0)),   # resident across steps
        ],
        out_specs=(pl.BlockSpec((tb, Hp), lambda i: (i, 0)),
                   pl.BlockSpec((tb, Bdp), lambda i: (i, 0))),
        compiler_params=pltpu.CompilerParams(
            dimension_semantics=("parallel",)),
    )(emb, mask3, params["w"], params["b"], d_rep_pad)
    return rep, score


# ----------------------------------------------------------------------------
# SiameseNetwork forward (mirrors the PyTorch module semantics)
# ----------------------------------------------------------------------------
class SiameseNetworkPallas:
    def __init__(self, query_params, document_params, match_type="dot_product"):
        self._hidden = query_params["w"].shape[1]
        self._qp = self._pad_params(query_params)
        self._dp = self._pad_params(document_params)
        self._normalize = match_type == "cosine_similarity"

    @staticmethod
    def _pad_params(params):
        # Zero-pad E/H to lane multiples once, at construction time.
        return {
            "emb": _pad_dim(params["emb"], 1, LANE),
            "w": _pad_dim(_pad_dim(params["w"], 0, LANE), 1, LANE),
            "b": _pad_dim(params["b"], 1, LANE),
        }

    def encode(self, tokens, is_q):
        params = self._qp if is_q else self._dp
        batch = tokens["input_ids"].shape[0]
        rep = encode_pallas(params, tokens["input_ids"],
                            tokens["attention_mask"],
                            do_normalize=self._normalize)
        return rep[:batch, :self._hidden]

    def __call__(self, document_words=None, query_keywords=None,
                 nb_negatives=None, is_score_batch=False):
        out = {}
        if document_words is None and query_keywords is None:
            return out
        if query_keywords is None:
            out["d_rep"] = self.encode(document_words, False)
            return out
        if document_words is None:
            out["q_rep"] = self.encode(query_keywords, True)
            return out

        # Both sides present: document encode (+normalize) in one call, query
        # encode (+normalize) fused with scoring in a second call.
        bq = query_keywords["input_ids"].shape[0]
        bd = document_words["input_ids"].shape[0]

        d_rep_pad = encode_pallas(self._dp, document_words["input_ids"],
                                  document_words["attention_mask"],
                                  do_normalize=self._normalize)
        out["d_rep"] = d_rep_pad[:bd, :self._hidden]

        # Row-pad d_rep to a multiple of 128 so the fused score store is
        # lane-dense; padded (zero) rows produce zero scores sliced away below.
        d_rep_score = _pad_dim(d_rep_pad, 0, LANE)

        q_rep_pad, score_pad = encode_and_score_pallas(
            self._qp, query_keywords["input_ids"],
            query_keywords["attention_mask"], d_rep_score,
            do_normalize=self._normalize)
        out["q_rep"] = q_rep_pad[:bq, :self._hidden]

        if nb_negatives is not None:
            # score[b, n] = q[b] . d[b * nb_negatives + n] == the diagonal
            # blocks of the full lane-dense q @ d.T computed in-kernel.
            idx = (jnp.arange(bq)[:, None] * nb_negatives
                   + jnp.arange(nb_negatives)[None, :])
            score = jnp.take_along_axis(score_pad[:bq], idx, axis=1)
        elif is_score_batch:
            score = score_pad[:bq, :bd]
        else:
            # TODO(synk): `torch.sum(x_query, x_document, dim=1, keepdim=True)`
            # in the reference module is not a valid torch call; this
            # fallthrough path is not modeled.
            raise NotImplementedError(
                "invalid fallthrough score path in reference module")
        out["score"] = score
        return out


# ----------------------------------------------------------------------------
# Plain-JAX reference (torch-faithful, exact-f32 elementwise pooling)
# ----------------------------------------------------------------------------
def _ref_encode(params, tokens):
    emb = params["emb"][tokens["input_ids"]]
    mask = tokens["attention_mask"].astype(jnp.float32)
    pooled = (emb * mask[:, :, None]).sum(1) / jnp.maximum(
        mask.sum(1, keepdims=True), 1.0)
    return jnp.tanh(pooled @ params["w"] + params["b"])


def _ref_normalize(x):
    return x / jnp.sqrt(jnp.sum(x * x, axis=-1, keepdims=True))


def _ref_forward(qp, dp, document_words, query_keywords, nb_negatives=None):
    d = _ref_normalize(_ref_encode(dp, document_words))
    q = _ref_normalize(_ref_encode(qp, query_keywords))
    if nb_negatives is not None:
        dn = d.reshape(q.shape[0], nb_negatives, -1)
        score = jnp.sum(q[:, None, :] * dn, axis=-1)
    else:
        score = q @ d.T
    return {"d_rep": d, "q_rep": q, "score": score}


# ----------------------------------------------------------------------------
# Main
# ----------------------------------------------------------------------------
def _make_encoder_params(key, vocab, embed, hidden):
    k1, k2, k3 = jax.random.split(key, 3)
    return {
        "emb": 0.1 * jax.random.normal(k1, (vocab, embed), jnp.float32),
        "w": 0.1 * jax.random.normal(k2, (embed, hidden), jnp.float32),
        "b": 0.1 * jax.random.normal(k3, (1, hidden), jnp.float32),
    }


def _make_tokens(key, batch, seq, vocab):
    k1, k2 = jax.random.split(key)
    input_ids = jax.random.randint(k1, (batch, seq), 0, vocab, dtype=jnp.int32)
    lengths = jax.random.randint(k2, (batch,), seq // 2, seq + 1, dtype=jnp.int32)
    mask = (jnp.arange(seq)[None, :] < lengths[:, None]).astype(jnp.int32)
    return {"input_ids": input_ids, "attention_mask": mask}


if __name__ == "__main__":
    B, S, V, E, H = 4, 8, 64, 32, 32
    NB_NEG = 3

    root = jax.random.PRNGKey(0)
    kq, kd, kt1, kt2, kt3 = jax.random.split(root, 5)

    q_params = _make_encoder_params(kq, V, E, H)
    d_params = _make_encoder_params(kd, V, E, H)
    model = SiameseNetworkPallas(q_params, d_params,
                                 match_type="cosine_similarity")

    query_tokens = _make_tokens(kt1, B, S, V)
    doc_tokens = _make_tokens(kt2, B, S, V)                 # in-batch docs
    doc_neg_tokens = _make_tokens(kt3, B * NB_NEG, S, V)    # per-query negatives

    # Path 1: is_score_batch=True  -> score = q @ d.T
    out1 = model(document_words=doc_tokens, query_keywords=query_tokens,
                 is_score_batch=True)
    jax.block_until_ready(out1["score"])

    # Path 2: nb_negatives -> score = sum(q.unsqueeze(1) * d.reshape(B,N,-1), -1)
    out2 = model(document_words=doc_neg_tokens, query_keywords=query_tokens,
                 nb_negatives=NB_NEG)
    jax.block_until_ready(out2["score"])

    # Verify against the plain-JAX reference.  Tolerance accounts for the MXU
    # doing f32 matmuls via bf16 passes at default precision while the
    # reference pooling is exact elementwise f32 (structural bugs would be
    # off by O(1), so this is still a meaningful check).
    ref1 = _ref_forward(q_params, d_params, doc_tokens, query_tokens)
    ref2 = _ref_forward(q_params, d_params, doc_neg_tokens, query_tokens,
                        nb_negatives=NB_NEG)
    for key in ("d_rep", "q_rep", "score"):
        np.testing.assert_allclose(np.asarray(out1[key]), np.asarray(ref1[key]),
                                   rtol=5e-3, atol=5e-3)
        np.testing.assert_allclose(np.asarray(out2[key]), np.asarray(ref2[key]),
                                   rtol=5e-3, atol=5e-3)

    assert out1["score"].shape == (B, B)
    assert out2["score"].shape == (B, NB_NEG)
    print("KERNEL_OK")
</pallas_src>

<mosaic_0001>
module attributes {stable_mosaic.version = 11 : i64} {
  func.func @_encode_kernel(%arg0: i32, %arg1: memref<8x8x128xf32, #tpu.memory_space<vmem>>, %arg2: memref<8x1x8xf32, #tpu.memory_space<vmem>>, %arg3: memref<128x128xf32, #tpu.memory_space<vmem>>, %arg4: memref<1x128xf32, #tpu.memory_space<vmem>>, %arg5: memref<8x128xf32, #tpu.memory_space<vmem>>) attributes {dimension_semantics = [#tpu.dimension_semantics<parallel>], iteration_bounds = array<i64: 1>, scalar_prefetch = 0 : i64, scratch_operands = 0 : i64, tpu.core_type = #tpu.core_type<tc>, window_params = [{transform_indices = @transform_0, window_bounds = array<i64: 8, 8, 128>}, {transform_indices = @transform_1, window_bounds = array<i64: 8, 1, 8>}, {pipeline_mode = #tpu.pipeline_mode<synchronous>, transform_indices = @transform_2, window_bounds = array<i64: 128, 128>}, {pipeline_mode = #tpu.pipeline_mode<synchronous>, transform_indices = @transform_3, window_bounds = array<i64: 1, 128>}, {transform_indices = @transform_4, window_bounds = array<i64: 8, 128>}]} {
    %c0 = arith.constant 0 : index
    %c0_0 = arith.constant 0 : index
    %c0_1 = arith.constant 0 : index
    %0 = vector.load %arg1[%c0, %c0_0, %c0_1] : memref<8x8x128xf32, #tpu.memory_space<vmem>>, vector<8x8x128xf32>
    %c0_2 = arith.constant 0 : index
    %c0_3 = arith.constant 0 : index
    %c0_4 = arith.constant 0 : index
    %1 = vector.load %arg2[%c0_2, %c0_3, %c0_4] : memref<8x1x8xf32, #tpu.memory_space<vmem>>, vector<8x1x8xf32>
    %c0_5 = arith.constant 0 : index
    %c0_6 = arith.constant 0 : index
    %2 = vector.load %arg3[%c0_5, %c0_6] : memref<128x128xf32, #tpu.memory_space<vmem>>, vector<128x128xf32>
    %c0_7 = arith.constant 0 : index
    %c0_8 = arith.constant 0 : index
    %3 = vector.load %arg4[%c0_7, %c0_8] : memref<1x128xf32, #tpu.memory_space<vmem>>, vector<1x128xf32>
    "tpu.trace_start"() <{level = 10 : i32, message = "bqs,bse->bqe"}> : () -> ()
    %cst = arith.constant dense<0.000000e+00> : vector<8x1x128xf32>
    %4 = tpu.matmul %1, %0, %cst {dimension_numbers = #tpu.dot_dimension_numbers<[2], [1], [1], [2], [0, 0, 0, 1, 1, 2], [0], [0]>} : vector<8x1x8xf32>, vector<8x8x128xf32>, vector<8x1x128xf32> -> vector<8x1x128xf32>
    "tpu.trace_stop"() : () -> ()
    %cst_9 = arith.constant dense<0.000000e+00> : vector<8x1xf32>
    %5 = vector.multi_reduction <add>, %1, %cst_9 [2] : vector<8x1x8xf32> to vector<8x1xf32>
    %cst_10 = arith.constant 1.000000e+00 : f32
    %6 = vector.broadcast %cst_10 : f32 to vector<8x1xf32>
    %7 = arith.maximumf %5, %6 : vector<8x1xf32>
    %8 = vector.shape_cast %4 : vector<8x1x128xf32> to vector<8x128xf32>
    %9 = vector.broadcast %7 : vector<8x1xf32> to vector<8x128xf32>
    %10 = arith.divf %8, %9 : vector<8x128xf32>
    %cst_11 = arith.constant dense<0.000000e+00> : vector<8x128xf32>
    %11 = tpu.matmul %10, %2, %cst_11 {dimension_numbers = #tpu.dot_dimension_numbers<[1], [0], [0], [1], [0, 0, 1, 1], [], []>} : vector<8x128xf32>, vector<128x128xf32>, vector<8x128xf32> -> vector<8x128xf32>
    %12 = vector.broadcast %3 : vector<1x128xf32> to vector<8x128xf32>
    %13 = arith.addf %11, %12 : vector<8x128xf32>
    %14 = math.tanh %13 : vector<8x128xf32>
    %15 = arith.mulf %14, %14 : vector<8x128xf32>
    %cst_12 = arith.constant dense<0.000000e+00> : vector<8xf32>
    %16 = vector.multi_reduction <add>, %15, %cst_12 [1] : vector<8x128xf32> to vector<8xf32>
    %17 = vector.shape_cast %16 : vector<8xf32> to vector<8x1xf32>
    %cst_13 = arith.constant 1.000000e-18 : f32
    %18 = vector.broadcast %cst_13 : f32 to vector<8x1xf32>
    %19 = arith.maximumf %17, %18 : vector<8x1xf32>
    %20 = math.rsqrt %19 : vector<8x1xf32>
    %21 = vector.broadcast %20 : vector<8x1xf32> to vector<8x128xf32>
    %22 = arith.mulf %14, %21 : vector<8x128xf32>
    %c0_14 = arith.constant 0 : index
    %c0_15 = arith.constant 0 : index
    %23 = vector.load %arg5[%c0_14, %c0_15] : memref<8x128xf32, #tpu.memory_space<vmem>>, vector<8x128xf32>
    tpu.vector_store %arg5[%c0_14, %c0_15], %22 {strides = array<i32>} : memref<8x128xf32, #tpu.memory_space<vmem>>, vector<8x128xf32>,
    return
  }
  func.func @transform_0(%arg0: i32) -> (i32, i32, i32) {
    %c0_i32 = arith.constant 0 : i32
    %c0_i32_0 = arith.constant 0 : i32
    %c0_i32_1 = arith.constant 0 : i32
    return %arg0, %c0_i32, %c0_i32_0 : i32, i32, i32
  }
  func.func @transform_1(%arg0: i32) -> (i32, i32, i32) {
    %c0_i32 = arith.constant 0 : i32
    %c0_i32_0 = arith.constant 0 : i32
    %c0_i32_1 = arith.constant 0 : i32
    return %arg0, %c0_i32, %c0_i32_0 : i32, i32, i32
  }
  func.func @transform_2(%arg0: i32) -> (i32, i32) {
    %c0_i32 = arith.constant 0 : i32
    %c0_i32_0 = arith.constant 0 : i32
    %c0_i32_1 = arith.constant 0 : i32
    return %c0_i32, %c0_i32_0 : i32, i32
  }
  func.func @transform_3(%arg0: i32) -> (i32, i32) {
    %c0_i32 = arith.constant 0 : i32
    %c0_i32_0 = arith.constant 0 : i32
    %c0_i32_1 = arith.constant 0 : i32
    return %c0_i32, %c0_i32_0 : i32, i32
  }
  func.func @transform_4(%arg0: i32) -> (i32, i32) {
    %c0_i32 = arith.constant 0 : i32
    %c0_i32_0 = arith.constant 0 : i32
    return %arg0, %c0_i32 : i32, i32
  }
}

</mosaic_0001>

<bundles_post_ra>
// kernel: tpu_custom_call.1
= control target key start
LH: loop header
LB: loop body
LE: loop exit
PB: predicated region body
PF: predicated region fallthrough
CT: control target
= control target key end

     0   :  { %9 = vsyncpa [#allocation3], 0  ;;  %s1283_s0 = inlined_call_operand.hbm [shape: f32[8,8,128], index: 0, kind: input, shape index: {}]   ;;  %s1284_s1 = inlined_call_operand.hbm [shape: f32[8,1,8], index: 1, kind: input, shape index: {}]   ;;  %s1285_s2 = inlined_call_operand.hbm [shape: f32[128,128], index: 2, kind: input, shape index: {}]   ;;  %s1286_s3 = inlined_call_operand.vmem [shape: f32[1,128], index: 3, kind: input, shape index: {}]   ;;  %s1287_s4 = inlined_call_operand.hbm [shape: f32[8,128], index: 4, kind: output, shape index: {}]  }
   0x1   :  { %10 = vsyncpa [#allocation6], 0 }
   0x2   :  { %11 = vsyncpa [#allocation4], 0  ;;  %s1154_s15 = smov [#allocation5]   ;;  %s1060_s19 = scalar_lea.hbm %s1284_s1, 128 }
   0x3   :  { %s29_s16 = sshll.u32 %s1154_s15, 4  ;;  %p1061_p0 = scmp.ne.s32.totalorder %s1284_s1, %s1060_s19  ;;  %s30_s16 = int_to_ptr.vmem [resolvable:$true] %s29_s16 }
   0x4   :  { %p1064_p1 = scmp.lt.u32.totalorder %s1060_s19, %s1284_s1 }
   0x6   :  { %p1066_p2 = pnand %p1064_p1, %p1061_p0 }
   0x8   :  { %1069 = shalt.err (!%p1066_p2)
}
   0x9   :  { %s1070_s24 = scalar_lea.vmem %s30_s16, 128  ;;  %p1075_p4 = scmp.lt.s32.totalorder %s30_s16, %s30_s16 }
   0xa   :  { %p1071_p3 = scmp.ne.s32.totalorder %s30_s16, %s1070_s24  ;;  %p1076_p5 = scmp.lt.s32.totalorder %s1070_s24, %s1070_s24 }
   0xc   :  { %p1077_p6 = por %p1076_p5, %p1075_p4 }
   0xe   :  { %p1078_p7 = pnand %p1077_p6, %p1071_p3 }
  0x10   :  { %1081 = shalt.err (!%p1078_p7)
}
  0x11   :  { %s1155_s25 = smov 16   ;;  %s1156_s26 = smov 1  }
  0x12   :  { %35 = dma.hbm_to_vmem [thread:$0]  %s1284_s1, 128, %s30_s16, [#allocation6], %s1155_s25, %s1155_s25, %s1156_s26  }
  0x13   :  { %s1157_s29 = smov [#allocation2]   ;;  %s1082_s7 = scalar_lea.hbm %s1283_s0, 1024 }
  0x14   :  { %s17_s30 = sshll.u32 %s1157_s29, 4  ;;  %p1083_p8 = scmp.ne.s32.totalorder %s1283_s0, %s1082_s7  ;;  %s18_s30 = int_to_ptr.vmem [resolvable:$true] %s17_s30 }
  0x15   :  { %p1086_p9 = scmp.lt.u32.totalorder %s1082_s7, %s1283_s0 }
  0x17   :  { %p1088_p10 = pnand %p1086_p9, %p1083_p8 }
  0x19   :  { %1091 = shalt.err (!%p1088_p10)
}
  0x1a   :  { %s1092_s12 = scalar_lea.vmem %s18_s30, 1024  ;;  %p1097_p12 = scmp.lt.s32.totalorder %s18_s30, %s18_s30 }
  0x1b   :  { %p1093_p11 = scmp.ne.s32.totalorder %s18_s30, %s1092_s12  ;;  %p1098_p13 = scmp.lt.s32.totalorder %s1092_s12, %s1092_s12 }
  0x1d   :  { %p1099_p0 = por %p1098_p13, %p1097_p12 }
  0x1f   :  { %p1100_p1 = pnand %p1099_p0, %p1093_p11 }
  0x21   :  { %1103 = shalt.err (!%p1100_p1)
}
  0x22   :  { %s1158_s1 = smov 128   ;;  %s1159_s13 = smov 8  }
  0x23   :  { %23 = dma.hbm_to_vmem [thread:$0]  %s1283_s0, 1024, %s18_s30, [#allocation3], %s1158_s1, %s1158_s1, %s1159_s13  }
  0x24   :  { %s1160_s16 = smov [#allocation7]   ;;  %s1104_s20 = scalar_lea.hbm %s1285_s2, 2048 }
  0x25   :  { %s41_s17 = sshll.u32 %s1160_s16, 4  ;;  %p1105_p2 = scmp.ne.s32.totalorder %s1285_s2, %s1104_s20  ;;  %s42_s17 = int_to_ptr.vmem [resolvable:$true] %s41_s17 }
  0x26   :  { %p1108_p3 = scmp.lt.u32.totalorder %s1104_s20, %s1285_s2 }
  0x28   :  { %p1110_p4 = pnand %p1108_p3, %p1105_p2 }
  0x2a   :  { %1113 = shalt.err (!%p1110_p4)
}
  0x2b   :  { %s1114_s25 = scalar_lea.vmem %s42_s17, 2048  ;;  %p1119_p6 = scmp.lt.s32.totalorder %s42_s17, %s42_s17 }
  0x2c   :  { %p1115_p5 = scmp.ne.s32.totalorder %s42_s17, %s1114_s25  ;;  %p1120_p7 = scmp.lt.s32.totalorder %s1114_s25, %s1114_s25 }
  0x2e   :  { %p1121_p8 = por %p1120_p7, %p1119_p6 }
  0x30   :  { %p1122_p9 = pnand %p1121_p8, %p1115_p5 }
  0x32   :  { %1125 = shalt.err (!%p1122_p9)
}
  0x33   :  { %47 = dma.hbm_to_vmem [thread:$0]  %s1285_s2, 2048, %s42_s17, [#allocation6], %s1158_s1, %s1158_s1, %s1159_s13  }
  0x34   :  { %1148 = dma.done.wait [#allocation3], 1024  }
  0x35   :  { %1149 = vsyncadd [#allocation3], 4294966272 }
  0x36   :  { %1150 = dma.done.wait [#allocation6], 2176  }
  0x37   :  { %1151 = vsyncadd [#allocation6], 4294965120  ;;  %v1161_v0 = vmov 0.0   ;;  %vm1162_vm0 = vmmov 0   ;;  %vm677_vm1 = vcmask 57344   ;;  %vm92_vm2 = vcmask 64512  }
  0x38   :  { %930 = vmatprep.subr.mxu1 %v1161_v0  ;;  %932 = vmatprep.mubr.msk.f32.mxu1 %vm1162_vm0, %v1161_v0  ;;  %v59_v1 = vld [vmem:[#allocation2] sm:$0xff]  ;;  %v60_v3 = vld [vmem:[#allocation2 + $0x8] sm:$0xff]  ;;  %v61_v7 = vld [vmem:[#allocation2 + $0x10] sm:$0xff]  ;;  %v1163_v28 = vmov 0.0|0.0   ;;  %v710_v50 = vlaneseq  ;;  %vm773_vm3 = vcmask 1041409   ;;  %vm776_vm4 = vcmask 1042434  }
  0x39   :  { %1002 = vmatprep.mubr.msk.f32.mxu0 %vm1162_vm0, %v1161_v0  ;;  %v67_v2 = vld [vmem:[#allocation5] sm:$0x1]  ;;  %931 = vmatpush3.msra.mxu1 %v59_v1  ;;  %v68_v4 = vld [vmem:[#allocation5 + $0x1] sm:$0x1]  ;;  %v70_v8 = vld [vmem:[#allocation5 + $0x3] sm:$0x1] }
  0x3a   :  { %v678_v5 = vsel %vm677_vm1, %v67_v2, 0.0  ;;  %933 = vmatmul.mubr.msk.f32.vlgmr.msra.gmra.mrb[0].mxu1 %vm92_vm2, %v67_v2  ;;  %935 = vmatprep.subr.mxu1 %v1161_v0  ;;  %v681_v6 = vsel %vm677_vm1, %v68_v4, 0.0  ;;  %v69_v9 = vld [vmem:[#allocation5 + $0x2] sm:$0x1]  ;;  %v687_v10 = vsel %vm677_vm1, %v70_v8, 0.0  ;;  %v62_v12 = vld [vmem:[#allocation2 + $0x18] sm:$0xff] }
  0x3b   :  { %936 = vmatpush3.msra.mxu1 %v60_v3  ;;  %937 = vmatprep.mubr.msk.f32.mxu1 %vm1162_vm0, %v1161_v0  ;;  %v684_v11 = vsel %vm677_vm1, %v69_v9, 0.0  ;;  %v72_v13 = vld [vmem:[#allocation5 + $0x5] sm:$0x1]  ;;  %v71_v14 = vld [vmem:[#allocation5 + $0x4] sm:$0x1]  ;;  %v64_v22 = vld [vmem:[#allocation2 + $0x28] sm:$0xff] }
  0x3c   :  { %940 = vmatprep.subr.mxu1 %v1161_v0  ;;  %679 = vadd.xlane.f32.xlu1 %v678_v5  ;;  %v693_v15 = vsel %vm677_vm1, %v72_v13, 0.0  ;;  %v690_v16 = vsel %vm677_vm1, %v71_v14, 0.0  ;;  %v63_v17 = vld [vmem:[#allocation2 + $0x20] sm:$0xff]  ;;  %v65_v23 = vld [vmem:[#allocation2 + $0x30] sm:$0xff]  ;;  %v66_v24 = vld [vmem:[#allocation2 + $0x38] sm:$0xff]  ;;  %v711_v52 = vshrl.u32 %v710_v50, 7 }
  0x3d   :  { %682 = vadd.xlane.f32.xlu0 %v681_v6  ;;  %v74_v18 = vld [vmem:[#allocation5 + $0x7] sm:$0x1]  ;;  %v73_v19 = vld [vmem:[#allocation5 + $0x6] sm:$0x1]  ;;  %v75_v25 = vld [vmem:[#allocation7] sm:$0xff]  ;;  %1005 = vmatprep.subr.bf16.mxu0 %v1163_v28  ;;  %vm779_vm5 = vcmask 1043459  }
  0x3e   :  { %938 = vmatmul.mubr.msk.f32.vlgmr.msra.gmra.mrb[2].mxu1 %vm92_vm2, %v68_v4  ;;  %v699_v20 = vsel %vm677_vm1, %v74_v18, 0.0  ;;  %v696_v21 = vsel %vm677_vm1, %v73_v19, 0.0  ;;  %v76_v26 = vld [vmem:[#allocation7 + $0x8] sm:$0xff]  ;;  %v77_v29 = vld [vmem:[#allocation7 + $0x10] sm:$0xff]  ;;  %v78_v30 = vld [vmem:[#allocation7 + $0x18] sm:$0xff]  ;;  %v712_v56 = vsub.s32 0, %v711_v52 }
  0x3f   :  { %941 = vmatpush3.msra.mxu1 %v61_v7  ;;  %942 = vmatprep.mubr.msk.f32.mxu1 %vm1162_vm0, %v1161_v0  ;;  %v1006_v27 = vpack.c.bf16 %v76_v26, %v75_v25  ;;  %v1009_v31 = vpack.c.bf16 %v78_v30, %v77_v29  ;;  %v79_v32 = vld [vmem:[#allocation7 + $0x20] sm:$0xff]  ;;  %v80_v33 = vld [vmem:[#allocation7 + $0x28] sm:$0xff]  ;;  %v81_v35 = vld [vmem:[#allocation7 + $0x30] sm:$0xff]  ;;  %vm782_vm6 = vcmask 1044484   ;;  %vm785_vm7 = vcmask 1045509   ;;  %s1164_s28 = smov [#allocation8]  }
  0x40   :  { %945 = vmatprep.subr.mxu1 %v1161_v0  ;;  %688 = vadd.xlane.f32.xlu1 %v687_v10  ;;  %v1012_v34 = vpack.c.bf16 %v80_v33, %v79_v32  ;;  %v82_v36 = vld [vmem:[#allocation7 + $0x38] sm:$0xff]  ;;  %v83_v38 = vld [vmem:[#allocation7 + $0x40] sm:$0xff]  ;;  %v84_v39 = vld [vmem:[#allocation7 + $0x48] sm:$0xff]  ;;  %vm788_vm8 = vcmask 1046534   ;;  %vm791_vm9 = vcmask 1047559   ;;  %s878_s29 = sshll.u32 %s1164_s28, 4  ;;  %s879_s29 = int_to_ptr.vmem [resolvable:$true] %s878_s29 }
  0x41   :  { %685 = vadd.xlane.f32.xlu0 %v684_v11  ;;  %1007 = vmatpush3.bf16.msra.mxu0 %v1006_v27  ;;  %v1015_v37 = vpack.c.bf16 %v82_v36, %v81_v35  ;;  %v1018_v40 = vpack.c.bf16 %v84_v39, %v83_v38  ;;  %v85_v41 = vld [vmem:[#allocation7 + $0x50] sm:$0xff]  ;;  %v86_v42 = vld [vmem:[#allocation7 + $0x58] sm:$0xff]  ;;  %v87_v44 = vld [vmem:[#allocation7 + $0x60] sm:$0xff]  ;;  %s1126_s30 = scalar_lea.vmem %s879_s29, 128  ;;  %p1131_p11 = scmp.lt.s32.totalorder %s879_s29, %s879_s29 }
  0x42   :  { %943 = vmatmul.mubr.msk.f32.vlgmr.msra.gmra.mrb[4].mxu1 %vm92_vm2, %v69_v9  ;;  %1008 = vmatprep.subr.bf16.mxu0 %v1163_v28  ;;  %v1021_v43 = vpack.c.bf16 %v86_v42, %v85_v41  ;;  %v88_v45 = vld [vmem:[#allocation7 + $0x68] sm:$0xff]  ;;  %v89_v47 = vld [vmem:[#allocation7 + $0x70] sm:$0xff]  ;;  %v90_v48 = vld [vmem:[#allocation7 + $0x78] sm:$0xff]  ;;  %p1127_p10 = scmp.ne.s32.totalorder %s879_s29, %s1126_s30  ;;  %p1132_p12 = scmp.lt.s32.totalorder %s1126_s30, %s1126_s30 }
  0x43   :  { %946 = vmatpush3.msra.mxu1 %v62_v12  ;;  %947 = vmatprep.mubr.msk.f32.mxu1 %vm1162_vm0, %v1161_v0  ;;  %v1024_v46 = vpack.c.bf16 %v88_v45, %v87_v44  ;;  %v1027_v49 = vpack.c.bf16 %v90_v48, %v89_v47 }
  0x44   :  { %950 = vmatprep.subr.mxu1 %v1161_v0  ;;  %694 = vadd.xlane.f32.xlu1 %v693_v15  ;;  %p1133_p13 = por %p1132_p12, %p1131_p11 }
  0x45   :  { %691 = vadd.xlane.f32.xlu0 %v690_v16  ;;  %1010 = vmatpush3.bf16.msra.mxu0 %v1009_v31 }
  0x46   :  { %948 = vmatmul.mubr.msk.f32.vlgmr.msra.gmra.mrb[6].mxu1 %vm92_vm2, %v70_v8  ;;  %1011 = vmatprep.subr.bf16.mxu0 %v1163_v28  ;;  %p1134_p0 = pnand %p1133_p13, %p1127_p10 }
  0x47   :  { %951 = vmatpush3.msra.mxu1 %v63_v17  ;;  %952 = vmatprep.mubr.msk.f32.mxu1 %vm1162_vm0, %v1161_v0 }
  0x48   :  { %955 = vmatprep.subr.mxu1 %v1161_v0  ;;  %700 = vadd.xlane.f32.xlu1 %v699_v20 }
  0x49   :  { %697 = vadd.xlane.f32.xlu0 %v696_v21  ;;  %1013 = vmatpush3.bf16.msra.mxu0 %v1012_v34 }
  0x4a   :  { %953 = vmatmul.mubr.msk.f32.vlgmr.msra.gmra.mrb[8].mxu1 %vm92_vm2, %v71_v14  ;;  %1014 = vmatprep.subr.bf16.mxu0 %v1163_v28 }
  0x4b   :  { %956 = vmatpush3.msra.mxu1 %v64_v22  ;;  %957 = vmatprep.mubr.msk.f32.mxu1 %vm1162_vm0, %v1161_v0 }
  0x4c   :  { %960 = vmatprep.subr.mxu1 %v1161_v0 }
  0x4d   :  { %1016 = vmatpush3.bf16.msra.mxu0 %v1015_v37 }
  0x4e   :  { %958 = vmatmul.mubr.msk.f32.vlgmr.msra.gmra.mrb[10].mxu1 %vm92_vm2, %v72_v13  ;;  %1017 = vmatprep.subr.bf16.mxu0 %v1163_v28 }
  0x4f   :  { %961 = vmatpush3.msra.mxu1 %v65_v23  ;;  %962 = vmatprep.mubr.msk.f32.mxu1 %vm1162_vm0, %v1161_v0 }
  0x50   :  { %965 = vmatprep.subr.mxu1 %v1161_v0 }
  0x51   :  { %1019 = vmatpush3.bf16.msra.mxu0 %v1018_v40 }
  0x52   :  { %963 = vmatmul.mubr.msk.f32.vlgmr.msra.gmra.mrb[12].mxu1 %vm92_vm2, %v73_v19  ;;  %1020 = vmatprep.subr.bf16.mxu0 %v1163_v28 }
  0x53   :  { %966 = vmatpush3.msra.mxu1 %v66_v24  ;;  %967 = vmatprep.mubr.msk.f32.mxu1 %vm1162_vm0, %v1161_v0 }
  0x55   :  { %1022 = vmatpush3.bf16.msra.mxu0 %v1021_v43 }
  0x56   :  { %968 = vmatmul.mubr.msk.f32.vlgmr.msra.gmra.mrb[14].mxu1 %vm92_vm2, %v74_v18  ;;  %1023 = vmatprep.subr.bf16.mxu0 %v1163_v28 }
  0x59   :  { %1025 = vmatpush3.bf16.msra.mxu0 %v1024_v46 }
  0x5a   :  { %1026 = vmatprep.subr.bf16.mxu0 %v1163_v28 }
  0x5d   :  { %1028 = vmatpush3.bf16.msra.mxu0 %v1027_v49 }
  0xc9   :  { %v680_v53 = vpop.xlane.xlu1 %679 }
  0xca   :  { %v683_v51 = vpop.xlane.xlu0 %682  ;;  %v702_v57 = vmax.f32 %v680_v53, 1.0 }
  0xcb   :  { %v703_v54 = vmax.f32 %v683_v51, 1.0 }
  0xcc   :  { %v713_v61 = vrot.slane %v702_v57, %v712_v56 }
  0xcd   :  { %v717_v58 = vrot.slane %v703_v54, %v712_v56  ;;  %v689_v60 = vpop.xlane.xlu1 %688 }
  0xce   :  { %v686_v55 = vpop.xlane.xlu0 %685  ;;  %v705_v63 = vmax.f32 %v689_v60, 1.0 }
  0xcf   :  { %v704_v59 = vmax.f32 %v686_v55, 1.0  ;;  %1040 = vrcp.f32 %v717_v58 }
  0xd0   :  { %1042 = vrcp.f32 %v713_v61  ;;  %v725_v1 = vrot.slane %v705_v63, %v712_v56 }
  0xd1   :  { %v721_v62 = vrot.slane %v704_v59, %v712_v56  ;;  %v695_v3 = vpop.xlane.xlu1 %694  ;;  %v896_v59 = vld [vmem:[%s1286_s3] ss:$0 sm:$0xff] }
  0xd2   :  { %v692_v0 = vpop.xlane.xlu0 %691  ;;  %v707_v6 = vmax.f32 %v695_v3, 1.0 }
  0xd3   :  { %1044 = vrcp.f32 %v721_v62  ;;  %v706_v2 = vmax.f32 %v692_v0, 1.0 }
  0xd4   :  { %1046 = vrcp.f32 %v725_v1  ;;  %v733_v12 = vrot.slane %v707_v6, %v712_v56 }
  0xd5   :  { %v729_v5 = vrot.slane %v706_v2, %v712_v56  ;;  %v701_v16 = vpop.xlane.xlu1 %700 }
  0xd6   :  { %v698_v8 = vpop.xlane.xlu0 %697  ;;  %v709_v22 = vmax.f32 %v701_v16, 1.0 }
  0xd7   :  { %1048 = vrcp.f32 %v729_v5  ;;  %v708_v13 = vmax.f32 %v698_v8, 1.0 }
  0xd8   :  { %1050 = vrcp.f32 %v733_v12  ;;  %v741_v29 = vrot.slane %v709_v22, %v712_v56 }
  0xd9   :  { %v1041_v9 = vpop.eup %1040  ;;  %v737_v21 = vrot.slane %v708_v13, %v712_v56 }
  0xda   :  { %v1043_v10 = vpop.eup %1042 }
  0xdb   :  { %1052 = vrcp.f32 %v737_v21 }
  0xdc   :  { %1054 = vrcp.f32 %v741_v29 }
  0xdd   :  { %v1045_v17 = vpop.eup %1044 }
  0xde   :  { %v1047_v26 = vpop.eup %1046 }
  0xe1   :  { %v1049_v33 = vpop.eup %1048 }
  0xe2   :  { %v1051_v39 = vpop.eup %1050 }
  0xe5   :  { %v1053_v45 = vpop.eup %1052 }
  0xe6   :  { %v1055_v51 = vpop.eup %1054 }
 0x10d   :  { %v162_v4 = vpop.f32.mrb[0].mxu1 }
 0x10e   :  { %v934_v7 = vpop.f32.mrb[1].mxu1  ;;  %v743_v18 = vmul.f32 %v1043_v10, %v162_v4 }
 0x111   :  { %v235_v11 = vpop.f32.mrb[2].mxu1 }
 0x112   :  { %v745_v14 = vmul.f32 %v1041_v9, %v235_v11  ;;  %v939_v15 = vpop.f32.mrb[3].mxu1 }
 0x114   :  { %v772_v19 = vrot.slane %v745_v14, 7 }
 0x115   :  { %v308_v20 = vpop.f32.mrb[4].mxu1 }
 0x116   :  { %v774_v23 = vsel %vm773_vm3, %v772_v19, %v743_v18  ;;  %v747_v24 = vmul.f32 %v1045_v17, %v308_v20  ;;  %v944_v25 = vpop.f32.mrb[5].mxu1 }
 0x118   :  { %v775_v27 = vrot.slane %v747_v24, 6 }
 0x119   :  { %v381_v28 = vpop.f32.mrb[6].mxu1 }
 0x11a   :  { %v777_v30 = vsel %vm776_vm4, %v775_v27, %v774_v23  ;;  %v749_v31 = vmul.f32 %v1047_v26, %v381_v28  ;;  %v949_v32 = vpop.f32.mrb[7].mxu1 }
 0x11c   :  { %v778_v34 = vrot.slane %v749_v31, 5 }
 0x11d   :  { %v454_v35 = vpop.f32.mrb[8].mxu1 }
 0x11e   :  { %v780_v36 = vsel %vm779_vm5, %v778_v34, %v777_v30  ;;  %v751_v37 = vmul.f32 %v1049_v33, %v454_v35  ;;  %v954_v38 = vpop.f32.mrb[9].mxu1 }
 0x120   :  { %v781_v40 = vrot.slane %v751_v37, 4 }
 0x121   :  { %v527_v41 = vpop.f32.mrb[10].mxu1 }
 0x122   :  { %v783_v42 = vsel %vm782_vm6, %v781_v40, %v780_v36  ;;  %v753_v43 = vmul.f32 %v1051_v39, %v527_v41  ;;  %v959_v44 = vpop.f32.mrb[11].mxu1 }
 0x124   :  { %v784_v46 = vrot.slane %v753_v43, 3 }
 0x125   :  { %v600_v47 = vpop.f32.mrb[12].mxu1 }
 0x126   :  { %v786_v48 = vsel %vm785_vm7, %v784_v46, %v783_v42  ;;  %v755_v49 = vmul.f32 %v1053_v45, %v600_v47  ;;  %v964_v50 = vpop.f32.mrb[13].mxu1 }
 0x128   :  { %v787_v52 = vrot.slane %v755_v49, 2 }
 0x129   :  { %v673_v53 = vpop.f32.mrb[14].mxu1 }
 0x12a   :  { %v757_v54 = vmul.f32 %v1055_v51, %v673_v53  ;;  %v969_v55 = vpop.f32.mrb[15].mxu1  ;;  %v789_v56 = vsel %vm788_vm8, %v787_v52, %v786_v48 }
 0x12c   :  { %v790_v57 = vrot.slane %v757_v54, 1 }
 0x12e   :  { %v792_v58 = vsel %vm791_vm9, %v790_v57, %v789_v56 }
 0x12f   :  { %1003 = vmatmul.mubr.f32.vlgmr.msra.gmra.mrb[0].mxu0 %v792_v58 }
 0x202   :  { %v860_v60 = vpop.f32.mrb[0].mxu0 }
 0x203   :  { %v861_v61 = vadd.f32 %v896_v59, %v860_v60  ;;  %v1004_v62 = vpop.f32.mrb[1].mxu0 }
 0x205   :  { %1056 = vtanh.f32 %v861_v61 }
 0x20f   :  { %v1057_v63 = vpop.eup %1056 }
 0x210   :  { %v865_v0 = vmul.f32 %v1057_v63, %v1057_v63 }
 0x212   :  { %866 = vadd.xlane.f32.xlu0 %v865_v0 }
 0x29f   :  { %v867_v1 = vpop.xlane.xlu0 %866 }
 0x2a0   :  { %v868_v2 = vmax.f32 %v867_v1, 1e-18 }
 0x2a2   :  { %1058 = vrsqrt.f32 %v868_v2 }
 0x2ac   :  { %v1059_v3 = vpop.eup %1058 }
 0x2ad   :  { %v870_v4 = vmul.f32 %v1059_v3, %v1057_v63 }
 0x2af   :  { %871 = vst [vmem:[#allocation8] sm:$0xff] %v870_v4 }
 0x2b0   :  { %1137 = shalt.err (!%p1134_p0)
}
 0x2b1   :  { %s1138_s6 = scalar_lea.hbm %s1287_s4, 128 }
 0x2b2   :  { %p1139_p1 = scmp.ne.s32.totalorder %s1287_s4, %s1138_s6  ;;  %p1142_p2 = scmp.lt.u32.totalorder %s1138_s6, %s1287_s4 }
 0x2b4   :  { %p1144_p3 = pnand %p1142_p2, %p1139_p1 }
 0x2b6   :  { %1147 = shalt.err (!%p1144_p3)
}
 0x2b7   :  { %881 = dma.vmem_to_hbm [thread:$0]  %s879_s29, 128, %s1287_s4, [#allocation4]  }
 0x2b8   :  { %1152 = dma.done.wait [#allocation4], 128  }
 0x2b9   :  { %1153 = vsyncadd [#allocation4], 4294967168 }
 0x2ba   :  { %885 = vsyncpa [#allocation3], 1 }
 0x2bb   :  { %886 = vsyncpa [#allocation6], 1 }
 0x2bc   :  { %887 = vsyncpa [#allocation4], 1 }

</bundles_post_ra>
